<compile_context>
chip_gen: v5e
topology: v5e:2x2
jax: 0.10.0
libtpu: 0.0.40
codegen_flags: <defaults>
</compile_context>

<pallas_src>
import functools
import math

import jax
import jax.numpy as jnp
from jax.experimental import pallas as pl
from jax.experimental.pallas import tpu as pltpu


def _tile(dim, target):
    """Full dim if it fits, else the (8/128-aligned) target tile."""
    return dim if dim <= target else target


# ----------------------------------------------------------------------------
# Tiled matmul (+bias, +activation): bf16 MXU inputs, f32 accumulation
# ----------------------------------------------------------------------------
def _mm_kernel(x_ref, w_ref, b_ref, o_ref, acc_ref, *, act):
    @pl.when(pl.program_id(2) == 0)
    def _():
        acc_ref[...] = jnp.zeros_like(acc_ref)

    acc_ref[...] += jnp.dot(x_ref[...], w_ref[...],
                            preferred_element_type=jnp.float32)

    @pl.when(pl.program_id(2) == pl.num_programs(2) - 1)
    def _():
        y = acc_ref[...] + b_ref[...]
        if act == "tanh":
            y = jnp.tanh(y)
        elif act == "relu":
            y = jnp.maximum(y, 0.0)
        elif act == "gelu":
            # TODO(synk): HF BERT uses exact (erf) GELU; tanh approx kept here.
            y = jax.nn.gelu(y, approximate=True)
        o_ref[...] = y.astype(o_ref.dtype)


def linear(x, w, b, act="none", out_dtype=jnp.bfloat16, tm=256, tn=256, tk=256):
    """y = act(x @ w + b)  --  tiled, pipelined, bf16-in / f32-accumulate."""
    M, K = x.shape
    N = w.shape[1]
    tm = _tile(M, tm)
    tn = _tile(N, tn)
    tk = _tile(K, tk)
    if K % tk != 0:          # keep reduction blocks exact (no OOB garbage in acc)
        tk = K
    grid = (pl.cdiv(M, tm), pl.cdiv(N, tn), K // tk)
    return pl.pallas_call(
        functools.partial(_mm_kernel, act=act),
        out_shape=jax.ShapeDtypeStruct((M, N), out_dtype),
        grid=grid,
        in_specs=[
            pl.BlockSpec((tm, tk), lambda i, j, k: (i, k)),
            pl.BlockSpec((tk, tn), lambda i, j, k: (k, j)),
            pl.BlockSpec((1, tn), lambda i, j, k: (0, j)),
        ],
        out_specs=pl.BlockSpec((tm, tn), lambda i, j, k: (i, j)),
        scratch_shapes=[pltpu.VMEM((tm, tn), jnp.float32)],
        compiler_params=pltpu.CompilerParams(
            dimension_semantics=("parallel", "parallel", "arbitrary")),
    )(x.astype(jnp.bfloat16), w.astype(jnp.bfloat16),
      b.reshape(1, N).astype(jnp.float32))


# ----------------------------------------------------------------------------
# (residual add +) LayerNorm, fused, row-tiled
# ----------------------------------------------------------------------------
def _ln_kernel(*refs, residual):
    if residual:
        x_ref, y_ref, g_ref, b_ref, o_ref = refs
        s = x_ref[...].astype(jnp.float32) + y_ref[...].astype(jnp.float32)
    else:
        x_ref, g_ref, b_ref, o_ref = refs
        s = x_ref[...].astype(jnp.float32)
    mu = jnp.mean(s, axis=-1, keepdims=True)
    var = jnp.mean((s - mu) ** 2, axis=-1, keepdims=True)
    o_ref[...] = ((s - mu) * jax.lax.rsqrt(var + 1e-12) * g_ref[...]
                  + b_ref[...]).astype(o_ref.dtype)


def add_layernorm(x, y, g, b, out_dtype=jnp.bfloat16, tm=512):
    M, H = x.shape
    tm = _tile(M, tm)
    row = pl.BlockSpec((tm, H), lambda i: (i, 0))
    vec = pl.BlockSpec((1, H), lambda i: (0, 0))
    residual = y is not None
    args = ((x, y) if residual else (x,)) + (
        g.reshape(1, H).astype(jnp.float32),
        b.reshape(1, H).astype(jnp.float32))
    in_specs = ([row, row] if residual else [row]) + [vec, vec]
    return pl.pallas_call(
        functools.partial(_ln_kernel, residual=residual),
        out_shape=jax.ShapeDtypeStruct((M, H), out_dtype),
        grid=(pl.cdiv(M, tm),),
        in_specs=in_specs,
        out_specs=row,
        compiler_params=pltpu.CompilerParams(
            dimension_semantics=("parallel",)),
    )(*args)


def layernorm(x, g, b, out_dtype=jnp.bfloat16, tm=512):
    return add_layernorm(x, None, g, b, out_dtype=out_dtype, tm=tm)


# ----------------------------------------------------------------------------
# Multi-head attention: H on lanes, head split in-kernel, several items / step
# ----------------------------------------------------------------------------
def _attn_kernel(qkv_ref, bias_ref, o_ref, *, heads, dh, scale):
    H = heads * dh
    qkv = qkv_ref[...]                       # (blk, L, 3H) bf16
    bias = bias_ref[...]                     # (blk, 1, L)  f32
    outs = []
    for h in range(heads):                   # static loop; lane slices
        q = qkv[:, :, h * dh:(h + 1) * dh]
        k = qkv[:, :, H + h * dh:H + (h + 1) * dh]
        v = qkv[:, :, 2 * H + h * dh:2 * H + (h + 1) * dh]
        s = jnp.einsum("bqd,bkd->bqk", q, k,
                       preferred_element_type=jnp.float32) * scale + bias
        m = jnp.max(s, axis=-1, keepdims=True)
        p = jnp.exp(s - m)
        p = p * pl.reciprocal(jnp.sum(p, axis=-1, keepdims=True), approx=True)
        outs.append(jnp.einsum("bqk,bkd->bqd", p.astype(v.dtype), v,
                               preferred_element_type=jnp.float32))
    o_ref[...] = jnp.concatenate(outs, axis=-1).astype(o_ref.dtype)


def attention(qkv, bias, heads, dh, out_dtype=jnp.bfloat16, blk=16):
    BN, L, threeH = qkv.shape
    H = heads * dh
    blk = _tile(BN, blk)
    return pl.pallas_call(
        functools.partial(_attn_kernel, heads=heads, dh=dh,
                          scale=1.0 / math.sqrt(dh)),
        out_shape=jax.ShapeDtypeStruct((BN, L, H), out_dtype),
        grid=(pl.cdiv(BN, blk),),
        in_specs=[pl.BlockSpec((blk, L, threeH), lambda s: (s, 0, 0)),
                  pl.BlockSpec((blk, 1, L), lambda s: (s, 0, 0))],
        out_specs=pl.BlockSpec((blk, L, H), lambda s: (s, 0, 0)),
        compiler_params=pltpu.CompilerParams(
            dimension_semantics=("parallel",)),
    )(qkv.astype(jnp.bfloat16), bias.astype(jnp.float32))


# ----------------------------------------------------------------------------
# BertPooler (cls dense+tanh) + NewsIdEmbedding MLP, fused
# ----------------------------------------------------------------------------
def _news_head_kernel(cls_ref, pw_ref, pb_ref, w1_ref, b1_ref, w2_ref, b2_ref,
                      o_ref):
    x = cls_ref[...]
    pooled = jnp.tanh(jnp.dot(x, pw_ref[...],
                              preferred_element_type=jnp.float32) + pb_ref[...])
    h1 = jnp.maximum(
        jnp.dot(pooled.astype(w1_ref.dtype), w1_ref[...],
                preferred_element_type=jnp.float32) + b1_ref[...], 0.0)
    y = jnp.dot(h1.astype(w2_ref.dtype), w2_ref[...],
                preferred_element_type=jnp.float32) + b2_ref[...]
    o_ref[...] = y.astype(o_ref.dtype)


def news_head(cls, pw, pb, w1, b1, w2, b2, tm=256):
    BN, H = cls.shape
    E = w2.shape[1]
    tm = _tile(BN, tm)
    bf = lambda a: a.astype(jnp.bfloat16)
    row = lambda a: a.reshape(1, -1).astype(jnp.float32)
    full = lambda s: pl.BlockSpec(s, lambda i: (0, 0))
    return pl.pallas_call(
        _news_head_kernel,
        out_shape=jax.ShapeDtypeStruct((BN, E), jnp.float32),
        grid=(pl.cdiv(BN, tm),),
        in_specs=[pl.BlockSpec((tm, H), lambda i: (i, 0)),
                  full((H, H)), full((1, H)),
                  full((H, H)), full((1, H)),
                  full((H, E)), full((1, E))],
        out_specs=pl.BlockSpec((tm, E), lambda i: (i, 0)),
        compiler_params=pltpu.CompilerParams(
            dimension_semantics=("parallel",)),
    )(bf(cls), bf(pw), row(pb), bf(w1), row(b1), bf(w2), row(b2))


# ----------------------------------------------------------------------------
# Fused tail: UserIdEmbedding (masked-mean + dense+tanh) + cold-start fusion +
#             IdSimilarity dot product, one kernel, one launch.
# ----------------------------------------------------------------------------
def _tail_kernel(hist_ref, hmask_ref, upw_ref, upb_ref,
                 ctr_ref, cpr_ref, cmask_ref, utr_ref, umask_ref, o_ref):
    hm = hmask_ref[...]                                            # (B, Nh, 1)
    pooled = (jnp.sum(hist_ref[...] * hm, axis=1)
              * pl.reciprocal(jnp.maximum(jnp.sum(hm, axis=1), 1.0),
                              approx=True))                        # (B, E)
    user_pr = jnp.tanh(
        jnp.dot(pooled.astype(upw_ref.dtype), upw_ref[...],
                preferred_element_type=jnp.float32) + upb_ref[...])  # (B, E)
    um = umask_ref[...]                                            # (B, 1)
    user = um * utr_ref[...] + (1.0 - um) * user_pr                # (B, E)
    cm = cmask_ref[...]                                            # (B, N, 1)
    curr = cm * ctr_ref[...] + (1.0 - cm) * cpr_ref[...]           # (B, N, E)
    o_ref[...] = jnp.sum(user[:, None, :] * curr, axis=-1)         # (B, N)


def tail_score(hist_emb, hist_mask, up_w, up_b,
               curr_tr, curr_pr, curr_mask, user_tr, user_mask):
    B, N, E = curr_tr.shape
    return pl.pallas_call(
        _tail_kernel,
        out_shape=jax.ShapeDtypeStruct((B, N), jnp.float32),
    )(hist_emb, hist_mask,
      up_w.astype(jnp.bfloat16), up_b.reshape(1, E).astype(jnp.float32),
      curr_tr, curr_pr, curr_mask, user_tr, user_mask)


# ----------------------------------------------------------------------------
# Parameter init (deterministic) + forward pass glue
# ----------------------------------------------------------------------------
def init_params(key, vocab, H, E, L, heads, ffn, news_card, user_card):
    ks = jax.random.split(key, 16)
    nrm = lambda k, shape: jax.random.normal(k, shape, jnp.float32) * 0.02
    z = lambda shape: jnp.zeros(shape, jnp.float32)
    o = lambda shape: jnp.ones(shape, jnp.float32)
    return dict(
        word_emb=nrm(ks[0], (vocab, H)),
        type_emb=nrm(ks[1], (2, H)),
        pos_emb=nrm(ks[2], (L, H)),
        ln_emb_g=o((H,)), ln_emb_b=z((H,)),
        wq=nrm(ks[3], (H, H)), bq=z((H,)),
        wk=nrm(ks[4], (H, H)), bk=z((H,)),
        wv=nrm(ks[5], (H, H)), bv=z((H,)),
        wo=nrm(ks[6], (H, H)), bo=z((H,)),
        ln1_g=o((H,)), ln1_b=z((H,)),
        w1=nrm(ks[7], (H, ffn)), b1=z((ffn,)),
        w2=nrm(ks[8], (ffn, H)), b2=z((H,)),
        ln2_g=o((H,)), ln2_b=z((H,)),
        pool_w=nrm(ks[9], (H, H)), pool_b=z((H,)),
        np_w1=nrm(ks[10], (H, H)), np_b1=z((H,)),
        np_w2=nrm(ks[11], (H, E)), np_b2=z((E,)),
        up_w=nrm(ks[12], (E, E)), up_b=z((E,)),
        news_emb_table=nrm(ks[13], (news_card + 1, E)),
        user_emb_table=nrm(ks[14], (user_card + 1, E)),
    )


def dmf_forward(params, curr_input_ids, curr_token_type, curr_input_mask,
                curr_idx, hist_idx, user_idx,
                curr_cold_mask, hist_cold_mask, user_cold_mask,
                *, heads=4):
    B, Ncur, L = curr_input_ids.shape
    H = params["word_emb"].shape[1]
    dh = H // heads
    BN = B * Ncur

    ids = curr_input_ids.reshape(BN, L)
    tt = curr_token_type.reshape(BN, L)
    am = curr_input_mask.reshape(BN, L)

    # --- tiny BERT-style encoder (stands in for curr_encoder) ---------------
    # TODO(synk): embedding gathers stay as XLA glue (scalar-prefetch gather
    # kernel only worthwhile at much larger BN).
    x = (params["word_emb"][ids] + params["type_emb"][tt]
         + params["pos_emb"][None]).reshape(BN * L, H)
    x = layernorm(x, params["ln_emb_g"], params["ln_emb_b"])       # bf16

    # fused QKV projection: one HBM pass over x instead of three
    wqkv = jnp.concatenate([params["wq"], params["wk"], params["wv"]], axis=1)
    bqkv = jnp.concatenate([params["bq"], params["bk"], params["bv"]])
    qkv = linear(x, wqkv, bqkv)                                    # (BN*L, 3H)

    bias = ((1.0 - am.astype(jnp.float32)) * -1e9).reshape(BN, 1, L)
    attn = attention(qkv.reshape(BN, L, 3 * H), bias, heads, dh)   # (BN, L, H)
    attn = linear(attn.reshape(BN * L, H), params["wo"], params["bo"])
    x = add_layernorm(x, attn, params["ln1_g"], params["ln1_b"])   # fused

    ff = linear(x, params["w1"], params["b1"], act="gelu")
    ff = linear(ff, params["w2"], params["b2"])
    x = add_layernorm(x, ff, params["ln2_g"], params["ln2_b"])     # fused
    last_hidden = x.reshape(BN, L, H)

    # --- pooler ('cls') + NewsIdEmbedding MLP, fused (dropout = eval no-op) --
    cls = last_hidden[:, 0, :]                                     # (BN, H)
    curr_id_pr = news_head(cls, params["pool_w"], params["pool_b"],
                           params["np_w1"], params["np_b1"],
                           params["np_w2"], params["np_b2"]
                           ).reshape(B, Ncur, -1)

    # --- trained id embeddings (gather = XLA glue) ---------------------------
    hist_id_emb = params["news_emb_table"][hist_idx].astype(jnp.float32)
    curr_id_tr = params["news_emb_table"][curr_idx].astype(jnp.float32)
    user_id_tr = params["user_emb_table"][user_idx].astype(jnp.float32)

    # --- fused tail: UserIdEmbedding + cold-start fusion + IdSimilarity ------
    hist_mask_f = hist_cold_mask.astype(jnp.float32).reshape(B, -1, 1)
    cm = curr_cold_mask.astype(jnp.float32).reshape(B, Ncur, 1)
    um = user_cold_mask.astype(jnp.float32).reshape(B, 1)
    score = tail_score(hist_id_emb, hist_mask_f,
                       params["up_w"], params["up_b"],
                       curr_id_tr, curr_id_pr, cm, user_id_tr, um)
    # IdSimilarity returns (B, 1, Ncur) in the original (eval path, no squeeze)
    return score[:, None, :]


# ----------------------------------------------------------------------------
if __name__ == "__main__":
    B, Ncur, Nh, L = 2, 2, 4, 8
    H = E = 32
    heads, ffn = 4, 128
    vocab, news_card, user_card = 64, 10, 6

    key = jax.random.PRNGKey(0)
    pk, ik = jax.random.split(key)
    params = init_params(pk, vocab, H, E, L, heads, ffn, news_card, user_card)

    ks = jax.random.split(ik, 8)
    curr_input_ids = jax.random.randint(ks[0], (B, Ncur, L), 0, vocab)
    curr_token_type = jnp.zeros((B, Ncur, L), jnp.int32)
    curr_input_mask = jnp.ones((B, Ncur, L), jnp.int32)
    curr_idx = jax.random.randint(ks[1], (B, Ncur), 0, news_card + 1)
    hist_idx = jax.random.randint(ks[2], (B, Nh), 0, news_card + 1)
    user_idx = jax.random.randint(ks[3], (B,), 0, user_card + 1)
    curr_cold_mask = jax.random.bernoulli(ks[4], 0.5, (B, Ncur))
    hist_cold_mask = jax.random.bernoulli(ks[5], 0.7, (B, Nh))
    user_cold_mask = jax.random.bernoulli(ks[6], 0.5, (B,))

    id_score = dmf_forward(params, curr_input_ids, curr_token_type,
                           curr_input_mask, curr_idx, hist_idx, user_idx,
                           curr_cold_mask, hist_cold_mask, user_cold_mask,
                           heads=heads)
    jax.block_until_ready(id_score)
    assert id_score.shape == (B, 1, Ncur)
    assert bool(jnp.all(jnp.isfinite(id_score)))
    print("KERNEL_OK")
</pallas_src>

<mosaic_0001>
module attributes {stable_mosaic.version = 11 : i64} {
  func.func @_ln_kernel(%arg0: i32, %arg1: memref<32x32xf32, #tpu.memory_space<vmem>>, %arg2: memref<1x32xf32, #tpu.memory_space<vmem>>, %arg3: memref<1x32xf32, #tpu.memory_space<vmem>>, %arg4: memref<32x32xbf16, #tpu.memory_space<vmem>>) attributes {dimension_semantics = [#tpu.dimension_semantics<parallel>], iteration_bounds = array<i64: 1>, scalar_prefetch = 0 : i64, scratch_operands = 0 : i64, tpu.core_type = #tpu.core_type<tc>, window_params = [{transform_indices = @transform_0, window_bounds = array<i64: 32, 32>}, {pipeline_mode = #tpu.pipeline_mode<synchronous>, transform_indices = @transform_1, window_bounds = array<i64: 1, 32>}, {pipeline_mode = #tpu.pipeline_mode<synchronous>, transform_indices = @transform_2, window_bounds = array<i64: 1, 32>}, {transform_indices = @transform_3, window_bounds = array<i64: 32, 32>}]} {
    %c0 = arith.constant 0 : index
    %c0_0 = arith.constant 0 : index
    %0 = vector.load %arg1[%c0, %c0_0] : memref<32x32xf32, #tpu.memory_space<vmem>>, vector<32x32xf32>
    %cst = arith.constant dense<0.000000e+00> : vector<32xf32>
    %1 = vector.multi_reduction <add>, %0, %cst [1] : vector<32x32xf32> to vector<32xf32>
    %2 = vector.shape_cast %1 : vector<32xf32> to vector<32x1xf32>
    %cst_1 = arith.constant 3.200000e+01 : f32
    %3 = vector.broadcast %cst_1 : f32 to vector<32x1xf32>
    %4 = arith.divf %2, %3 : vector<32x1xf32>
    %5 = vector.broadcast %4 : vector<32x1xf32> to vector<32x32xf32>
    %6 = arith.subf %0, %5 : vector<32x32xf32>
    %7 = arith.mulf %6, %6 : vector<32x32xf32>
    %cst_2 = arith.constant dense<0.000000e+00> : vector<32xf32>
    %8 = vector.multi_reduction <add>, %7, %cst_2 [1] : vector<32x32xf32> to vector<32xf32>
    %9 = vector.shape_cast %8 : vector<32xf32> to vector<32x1xf32>
    %cst_3 = arith.constant 3.200000e+01 : f32
    %10 = vector.broadcast %cst_3 : f32 to vector<32x1xf32>
    %11 = arith.divf %9, %10 : vector<32x1xf32>
    %12 = vector.broadcast %4 : vector<32x1xf32> to vector<32x32xf32>
    %13 = arith.subf %0, %12 : vector<32x32xf32>
    %cst_4 = arith.constant 9.99999996E-13 : f32
    %14 = vector.broadcast %cst_4 : f32 to vector<32x1xf32>
    %15 = arith.addf %11, %14 : vector<32x1xf32>
    %16 = math.rsqrt %15 : vector<32x1xf32>
    %17 = vector.broadcast %16 : vector<32x1xf32> to vector<32x32xf32>
    %18 = arith.mulf %13, %17 : vector<32x32xf32>
    %c0_5 = arith.constant 0 : index
    %c0_6 = arith.constant 0 : index
    %19 = vector.load %arg2[%c0_5, %c0_6] : memref<1x32xf32, #tpu.memory_space<vmem>>, vector<1x32xf32>
    %20 = vector.broadcast %19 : vector<1x32xf32> to vector<32x32xf32>
    %21 = arith.mulf %18, %20 : vector<32x32xf32>
    %c0_7 = arith.constant 0 : index
    %c0_8 = arith.constant 0 : index
    %22 = vector.load %arg3[%c0_7, %c0_8] : memref<1x32xf32, #tpu.memory_space<vmem>>, vector<1x32xf32>
    %23 = vector.broadcast %22 : vector<1x32xf32> to vector<32x32xf32>
    %24 = arith.addf %21, %23 : vector<32x32xf32>
    %25 = arith.truncf %24 : vector<32x32xf32> to vector<32x32xbf16>
    %c0_9 = arith.constant 0 : index
    %c0_10 = arith.constant 0 : index
    %26 = vector.load %arg4[%c0_9, %c0_10] : memref<32x32xbf16, #tpu.memory_space<vmem>>, vector<32x32xbf16>
    tpu.vector_store %arg4[%c0_9, %c0_10], %25 {strides = array<i32>} : memref<32x32xbf16, #tpu.memory_space<vmem>>, vector<32x32xbf16>,
    return
  }
  func.func @transform_0(%arg0: i32) -> (i32, i32) {
    %c0_i32 = arith.constant 0 : i32
    %c0_i32_0 = arith.constant 0 : i32
    return %arg0, %c0_i32 : i32, i32
  }
  func.func @transform_1(%arg0: i32) -> (i32, i32) {
    %c0_i32 = arith.constant 0 : i32
    %c0_i32_0 = arith.constant 0 : i32
    %c0_i32_1 = arith.constant 0 : i32
    return %c0_i32, %c0_i32_0 : i32, i32
  }
  func.func @transform_2(%arg0: i32) -> (i32, i32) {
    %c0_i32 = arith.constant 0 : i32
    %c0_i32_0 = arith.constant 0 : i32
    %c0_i32_1 = arith.constant 0 : i32
    return %c0_i32, %c0_i32_0 : i32, i32
  }
  func.func @transform_3(%arg0: i32) -> (i32, i32) {
    %c0_i32 = arith.constant 0 : i32
    %c0_i32_0 = arith.constant 0 : i32
    return %arg0, %c0_i32 : i32, i32
  }
}

</mosaic_0001>

<bundles_post_ra>
// kernel: tpu_custom_call.1
= control target key start
LH: loop header
LB: loop body
LE: loop exit
PB: predicated region body
PF: predicated region fallthrough
CT: control target
= control target key end

     0   :  { %8 = vsyncpa [#allocation3], 0  ;;  %s355_s0 = inlined_call_operand.hbm [shape: f32[32,32], index: 0, kind: input, shape index: {}]   ;;  %s356_s1 = inlined_call_operand.hbm [shape: f32[1,32], index: 1, kind: input, shape index: {}]   ;;  %s357_s2 = inlined_call_operand.vmem [shape: f32[1,32], index: 2, kind: input, shape index: {}]   ;;  %s358_s3 = inlined_call_operand.hbm [shape: bf16[32,32], index: 3, kind: output, shape index: {}]  }
   0x1   :  { %9 = vsyncpa [#allocation6], 0 }
   0x2   :  { %10 = vsyncpa [#allocation4], 0  ;;  %s15_s14 = sshll.u32 %s355_s0, 4  ;;  %s288_s15 = smov [#allocation2]   ;;  %s16_s14 = int_to_ptr.hbm [resolvable:$true] %s15_s14 }
   0x3   :  { %s17_s16 = sshll.u32 %s288_s15, 4  ;;  %s29_s19 = sshll.u32 %s356_s1, 4  ;;  %s18_s16 = int_to_ptr.vmem [resolvable:$true] %s17_s16  ;;  %s30_s19 = int_to_ptr.hbm [resolvable:$true] %s29_s19 }
   0x4   :  { %s289_s20 = smov 128   ;;  %s290_s21 = smov 8  }
   0x5   :  { %23 = dma.hbm_to_vmem [thread:$0]  %s16_s14, 512, %s18_s16, [#allocation3], %s289_s20, %s289_s20, %s290_s21  }
   0x6   :  { %s291_s22 = smov [#allocation5]  }
   0x7   :  { %s31_s23 = sshll.u32 %s291_s22, 4  ;;  %s32_s23 = int_to_ptr.vmem [resolvable:$true] %s31_s23 }
   0x8   :  { %34 = dma.hbm_to_vmem [thread:$0]  %s30_s19, 16, %s32_s23, [#allocation6]  }
   0x9   :  { %282 = dma.done.wait [#allocation3], 512  }
   0xa   :  { %283 = vsyncadd [#allocation3], 4294966784 }
   0xb   :  { %284 = dma.done.wait [#allocation6], 16  }
   0xc   :  { %285 = vsyncadd [#allocation6], 4294967280  ;;  %vm49_vm0 = vcmask 261120   ;;  %v47_v0 = vld [vmem:[#allocation2 + $0x10] sm:$0xff]  ;;  %v45_v1 = vld [vmem:[#allocation2] sm:$0xff]  ;;  %v292_v8 = vmov 32.0  }
   0xd   :  { %v56_v2 = vsel %vm49_vm0, %v47_v0, 0.0  ;;  %v50_v3 = vsel %vm49_vm0, %v45_v1, 0.0  ;;  %v48_v4 = vld [vmem:[#allocation2 + $0x18] sm:$0xff]  ;;  %v46_v5 = vld [vmem:[#allocation2 + $0x8] sm:$0xff]  ;;  %200 = vrcp.f32 %v292_v8  ;;  %v198_v61 = vld [vmem:[#allocation5] ss:$0 sm:$0xff] }
   0xe   :  { %57 = vadd.xlane.f32.xlu1 %v56_v2  ;;  %51 = vadd.xlane.f32.xlu0 %v50_v3  ;;  %v59_v6 = vsel %vm49_vm0, %v48_v4, 0.0  ;;  %v53_v7 = vsel %vm49_vm0, %v46_v5, 0.0  ;;  %v199_v2 = vld [vmem:[%s357_s2] ss:$0 sm:$0xff]  ;;  %vm165_vm10 = vcmask 257024   ;;  %s293_s2 = smov [#allocation7]  }
   0xf   :  { %s174_s24 = sshll.u32 %s293_s2, 4  ;;  %s176_s27 = sshll.u32 %s358_s3, 4  ;;  %s175_s24 = int_to_ptr.vmem [resolvable:$true] %s174_s24  ;;  %s177_s27 = int_to_ptr.hbm [resolvable:$true] %s176_s27 }
  0x10   :  { %s294_s28 = smov 64   ;;  %s295_s29 = smov 4  }
  0x13   :  { %v201_v9 = vpop.eup %200 }
  0x14   :  { %v63_v10 = vmul.f32 32.0, %v201_v9  ;;  %vm67_vm1 = vweird.f32 %v201_v9 }
  0x16   :  { %60 = vadd.xlane.f32.xlu1 %v59_v6  ;;  %54 = vadd.xlane.f32.xlu0 %v53_v7  ;;  %v64_v11 = vsub.f32 1.0, %v63_v10 }
  0x18   :  { %v65_v12 = vmul.f32 %v201_v9, %v64_v11 }
  0x1a   :  { %v66_v13 = vadd.f32 %v201_v9, %v65_v12 }
  0x1c   :  { %v68_v14 = vsel %vm67_vm1, %v201_v9, %v66_v13 }
  0x81   :  { %v58_v15 = vpop.xlane.xlu1 %57  ;;  %v52_v16 = vpop.xlane.xlu0 %51 }
  0x82   :  { %v71_v17 = vmul.f32 %v68_v14, %v58_v15  ;;  %v69_v18 = vmul.f32 %v68_v14, %v52_v16 }
  0x84   :  { %v326_v19 = vsub.f32 %v47_v0, %v71_v17  ;;  %v73_v20 = vsub.f32 %v45_v1, %v69_v18 }
  0x86   :  { %v79_v21 = vmul.f32 %v326_v19, %v326_v19  ;;  %v77_v22 = vmul.f32 %v73_v20, %v73_v20 }
  0x88   :  { %v87_v23 = vsel %vm49_vm0, %v79_v21, 0.0  ;;  %v81_v24 = vsel %vm49_vm0, %v77_v22, 0.0 }
  0x89   :  { %v61_v25 = vpop.xlane.xlu1 %60  ;;  %88 = vadd.xlane.f32.xlu0 %v87_v23  ;;  %82 = vadd.xlane.f32.xlu2 %v81_v24  ;;  %v55_v26 = vpop.xlane.xlu0 %54 }
  0x8a   :  { %v72_v27 = vmul.f32 %v68_v14, %v61_v25  ;;  %v70_v28 = vmul.f32 %v68_v14, %v55_v26 }
  0x8c   :  { %v332_v29 = vsub.f32 %v48_v4, %v72_v27  ;;  %v334_v30 = vsub.f32 %v46_v5, %v70_v28 }
  0x8e   :  { %v80_v31 = vmul.f32 %v332_v29, %v332_v29  ;;  %v78_v32 = vmul.f32 %v334_v30, %v334_v30 }
  0x90   :  { %v90_v33 = vsel %vm49_vm0, %v80_v31, 0.0  ;;  %v84_v34 = vsel %vm49_vm0, %v78_v32, 0.0 }
  0x91   :  { %91 = vadd.xlane.f32.xlu1 %v90_v33  ;;  %85 = vadd.xlane.f32.xlu2 %v84_v34 }
  0xfc   :  { %v83_v35 = vpop.xlane.xlu2 %82  ;;  %v89_v36 = vpop.xlane.xlu0 %88 }
  0xfd   :  { %v93_v37 = vmul.f32 %v83_v35, %v68_v14  ;;  %v95_v38 = vmul.f32 %v89_v36, %v68_v14 }
  0xff   :  { %v97_v39 = vadd.f32 1e-12, %v93_v37  ;;  %v99_v40 = vadd.f32 1e-12, %v95_v38 }
 0x101   :  { %202 = vrsqrt.f32 %v97_v39  ;;  %vm107_vm4 = vweird.f32 %v97_v39  ;;  %vm127_vm6 = vweird.f32 %v99_v40 }
 0x102   :  { %204 = vrsqrt.f32 %v99_v40 }
 0x104   :  { %v92_v41 = vpop.xlane.xlu1 %91  ;;  %v86_v42 = vpop.xlane.xlu2 %85 }
 0x105   :  { %v96_v43 = vmul.f32 %v92_v41, %v68_v14  ;;  %v94_v44 = vmul.f32 %v86_v42, %v68_v14 }
 0x107   :  { %v203_v45 = vpop.eup %202  ;;  %v100_v46 = vadd.f32 1e-12, %v96_v43  ;;  %v98_v47 = vadd.f32 1e-12, %v94_v44 }
 0x108   :  { %v205_v48 = vpop.eup %204  ;;  %v102_v49 = vmul.f32 %v203_v45, %v97_v39  ;;  %vm108_vm2 = vweird.f32 %v203_v45 }
 0x109   :  { %v122_v50 = vmul.f32 %v205_v48, %v99_v40  ;;  %206 = vrsqrt.f32 %v100_v46  ;;  %vm128_vm3 = vweird.f32 %v205_v48  ;;  %vm109_vm5 = vmor %vm107_vm4, %vm108_vm2  ;;  %vm137_vm11 = vweird.f32 %v100_v46 }
 0x10a   :  { %v103_v51 = vmul.f32 %v203_v45, %v102_v49  ;;  %208 = vrsqrt.f32 %v98_v47  ;;  %vm129_vm7 = vmor %vm127_vm6, %vm128_vm3  ;;  %vm117_vm13 = vweird.f32 %v98_v47 }
 0x10b   :  { %v123_v52 = vmul.f32 %v205_v48, %v122_v50 }
 0x10c   :  { %v104_v53 = vmul.f32 0.5, %v103_v51 }
 0x10d   :  { %v124_v54 = vmul.f32 0.5, %v123_v52 }
 0x10e   :  { %v105_v55 = vsub.f32 1.5, %v104_v53 }
 0x10f   :  { %v207_v56 = vpop.eup %206  ;;  %v125_v57 = vsub.f32 1.5, %v124_v54 }
 0x110   :  { %v209_v58 = vpop.eup %208  ;;  %v106_v59 = vmul.f32 %v203_v45, %v105_v55  ;;  %v132_v60 = vmul.f32 %v207_v56, %v100_v46  ;;  %vm138_vm8 = vweird.f32 %v207_v56 }
 0x111   :  { %v126_v62 = vmul.f32 %v205_v48, %v125_v57  ;;  %v112_v63 = vmul.f32 %v209_v58, %v98_v47  ;;  %vm118_vm9 = vweird.f32 %v209_v58  ;;  %vm139_vm12 = vmor %vm137_vm11, %vm138_vm8 }
 0x112   :  { %v110_v0 = vsel %vm109_vm5, %v203_v45, %v106_v59  ;;  %v133_v1 = vmul.f32 %v207_v56, %v132_v60  ;;  %vm119_vm14 = vmor %vm117_vm13, %vm118_vm9 }
 0x113   :  { %v141_v3 = vmul.f32 %v110_v0, %v73_v20  ;;  %v130_v4 = vsel %vm129_vm7, %v205_v48, %v126_v62  ;;  %v113_v5 = vmul.f32 %v209_v58, %v112_v63 }
 0x114   :  { %v143_v6 = vmul.f32 %v130_v4, %v326_v19  ;;  %v134_v7 = vmul.f32 0.5, %v133_v1 }
 0x115   :  { %v149_v8 = vmul.f32 %v198_v61, %v141_v3  ;;  %v114_v9 = vmul.f32 0.5, %v113_v5 }
 0x116   :  { %v151_v10 = vmul.f32 %v198_v61, %v143_v6  ;;  %v135_v11 = vsub.f32 1.5, %v134_v7 }
 0x117   :  { %v157_v12 = vadd.f32 %v199_v2, %v149_v8  ;;  %v115_v13 = vsub.f32 1.5, %v114_v9 }
 0x118   :  { %v159_v14 = vadd.f32 %v199_v2, %v151_v10  ;;  %v136_v15 = vmul.f32 %v207_v56, %v135_v11 }
 0x119   :  { %v161_v16 = vpack.c.bf16 %v157_v12, %v157_v12  ;;  %v116_v17 = vmul.f32 %v209_v58, %v115_v13 }
 0x11a   :  { %v163_v18 = vpack.c.bf16 %v159_v14, %v159_v14  ;;  %v140_v20 = vsel %vm139_vm12, %v207_v56, %v136_v15 }
 0x11b   :  { %166 = vst.msk [vmem:[#allocation7] sm:$0xf] %vm165_vm10, %v161_v16  ;;  %v144_v19 = vmul.f32 %v140_v20, %v332_v29  ;;  %v120_v21 = vsel %vm119_vm14, %v209_v58, %v116_v17 }
 0x11c   :  { %168 = vst.msk [vmem:[#allocation7 + $0x8] sm:$0xf] %vm165_vm10, %v163_v18  ;;  %v142_v22 = vmul.f32 %v120_v21, %v334_v30 }
 0x11d   :  { %v152_v23 = vmul.f32 %v198_v61, %v144_v19 }
 0x11e   :  { %v150_v24 = vmul.f32 %v198_v61, %v142_v22 }
 0x11f   :  { %v160_v25 = vadd.f32 %v199_v2, %v152_v23 }
 0x120   :  { %v158_v26 = vadd.f32 %v199_v2, %v150_v24 }
 0x121   :  { %v164_v27 = vpack.c.bf16 %v160_v25, %v160_v25 }
 0x122   :  { %v162_v28 = vpack.c.bf16 %v158_v26, %v158_v26 }
 0x123   :  { %169 = vst.msk [vmem:[#allocation7 + $0xc] sm:$0xf] %vm165_vm10, %v164_v27 }
 0x124   :  { %167 = vst.msk [vmem:[#allocation7 + $0x4] sm:$0xf] %vm165_vm10, %v162_v28 }
 0x125   :  { %182 = dma.vmem_to_hbm [thread:$0]  %s175_s24, 256, %s177_s27, [#allocation4], %s294_s28, %s294_s28, %s295_s29  }
 0x126   :  { %286 = dma.done.wait [#allocation4], 256  }
 0x127   :  { %287 = vsyncadd [#allocation4], 4294967040 }
 0x128   :  { %187 = vsyncpa [#allocation3], 1 }
 0x129   :  { %188 = vsyncpa [#allocation6], 1 }
 0x12a   :  { %189 = vsyncpa [#allocation4], 1 }

</bundles_post_ra>
